<compile_context>
chip_gen: v7x
topology: tpu7x:2x2x1
jax: 0.10.0
libtpu: 0.0.40
codegen_flags: <defaults>
</compile_context>

<pallas_src>
import jax
import jax.numpy as jnp
from jax.experimental import pallas as pl
from jax.experimental.pallas import tpu as pltpu


def deepritz_kernel(
    x_ref,        # [input_dim, tile_n]
    w_in_ref,     # [m, input_dim]
    b_in_ref,     # [m, 1]
    w_hid_ref,    # [6, m, m]   (linear2..linear7, PyTorch-native [out,in])
    b_hid_ref,    # [6, m, 1]
    w_out_ref,    # [out_dim, m]
    b_out_ref,    # [out_dim, 1]
    o_ref,        # [out_dim, tile_n]
):
    x = x_ref[...]

    def linear(w, b, v):
        # [out, in] @ [in, tile_n] + [out, 1]  ->  [out, tile_n]
        return jnp.dot(w, v, preferred_element_type=jnp.float32) + b

    # y = linear_input(x)
    y = linear(w_in_ref[...], b_in_ref[...], x)            # [m, tile_n]

    # Three residual blocks: y = y + tanh(linear_{2k+1}(tanh(linear_{2k}(y))))
    for j in range(3):
        w_a = w_hid_ref[2 * j]
        b_a = b_hid_ref[2 * j]
        w_b = w_hid_ref[2 * j + 1]
        b_b = b_hid_ref[2 * j + 1]
        h = jnp.tanh(linear(w_a, b_a, y))
        y = y + jnp.tanh(linear(w_b, b_b, h))

    # output = linear_output(y) -> lane-dense [out_dim, tile_n] store.
    o_ref[...] = linear(w_out_ref[...], b_out_ref[...], y).astype(o_ref.dtype)


def _round_up(v, mult):
    return ((v + mult - 1) // mult) * mult


def deep_ritz_net(x, params, *, tile_n=2048):
    """x: [N, input_dim]. params: PyTorch-native weights [out,in], biases [out,1]."""
    n, input_dim = x.shape
    m = params["w_in"].shape[0]
    out_dim = params["w_out"].shape[0]

    # Batch goes on lanes -> pad to a 128 multiple; pick a 128-multiple tile.
    n_round = _round_up(max(n, 1), 128)
    tile = min(_round_up(tile_n, 128), n_round)
    if tile >= n_round and n_round >= 256:
        # Keep at least 2 grid steps so v7x's two TensorCores both get work.
        tile = _round_up(-(-n_round // 2), 128)
    n_pad = _round_up(n_round, tile)
    grid = (n_pad // tile,)

    # Transposed, lane-padded input: [input_dim, n_pad].
    x_t = jnp.pad(jnp.transpose(x), ((0, 0), (0, n_pad - n)))

    # Pack the six hidden layers into single operands.
    w_hid = jnp.stack([params[f"w{i}"] for i in range(2, 8)])   # [6, m, m]
    b_hid = jnp.stack([params[f"b{i}"] for i in range(2, 8)])   # [6, m, 1]

    args = (x_t, params["w_in"], params["b_in"], w_hid, b_hid,
            params["w_out"], params["b_out"])

    const2 = lambda i: (0, 0)
    const3 = lambda i: (0, 0, 0)
    in_specs = [
        pl.BlockSpec((input_dim, tile), lambda i: (0, i)),   # x tiles walk lanes
        pl.BlockSpec((m, input_dim), const2),                # weights resident
        pl.BlockSpec((m, 1), const2),
        pl.BlockSpec((6, m, m), const3),
        pl.BlockSpec((6, m, 1), const3),
        pl.BlockSpec((out_dim, m), const2),
        pl.BlockSpec((out_dim, 1), const2),
    ]
    out_spec = pl.BlockSpec((out_dim, tile), lambda i: (0, i))

    flops = 2 * n_pad * (input_dim * m + 6 * m * m + m * out_dim)
    transcendentals = 6 * n_pad * m
    weight_bytes = 4 * (m * input_dim + m + 6 * m * m + 6 * m
                        + out_dim * m + out_dim)
    bytes_accessed = n_pad * (input_dim + out_dim) * 4 + weight_bytes

    out_pad = pl.pallas_call(
        deepritz_kernel,
        out_shape=jax.ShapeDtypeStruct((out_dim, n_pad), jnp.float32),
        grid_spec=pltpu.PrefetchScalarGridSpec(
            num_scalar_prefetch=0,
            grid=grid,
            in_specs=in_specs,
            out_specs=out_spec,
        ),
        compiler_params=pltpu.CompilerParams(
            # Batch tiles are independent -> megacore-shardable on v7x.
            dimension_semantics=("parallel",),
        ),
        cost_estimate=pl.CostEstimate(
            flops=flops,
            transcendentals=transcendentals,
            bytes_accessed=bytes_accessed,
        ),
    )(*args)

    # Back to the PyTorch-facing layout [N, out_dim].
    return jnp.transpose(out_pad[:, :n])


def init_params(key, input_dim=3, output_dim=1, m=20):
    """PyTorch-style Linear init U(-1/sqrt(fan_in), 1/sqrt(fan_in)).
    Weights kept PyTorch-native [out, in]; biases as [out, 1]."""
    layer_dims = [
        ("in", input_dim, m),
        ("2", m, m), ("3", m, m), ("4", m, m),
        ("5", m, m), ("6", m, m), ("7", m, m),
        ("out", m, output_dim),
    ]
    params = {}
    keys = jax.random.split(key, 2 * len(layer_dims))
    for i, (name, fan_in, fan_out) in enumerate(layer_dims):
        bound = 1.0 / jnp.sqrt(jnp.float32(fan_in))
        wk, bk = keys[2 * i], keys[2 * i + 1]
        wname = f"w_{name}" if name in ("in", "out") else f"w{name}"
        bname = f"b_{name}" if name in ("in", "out") else f"b{name}"
        params[wname] = jax.random.uniform(
            wk, (fan_out, fan_in), jnp.float32, -bound, bound)
        params[bname] = jax.random.uniform(
            bk, (fan_out, 1), jnp.float32, -bound, bound)
    return params


def deep_ritz_net_ref(x, p):
    """Pure-JAX reference mirroring the PyTorch forward exactly (x @ W.T + b)."""
    def lin(v, w, b):
        return v @ w.T + b[:, 0]
    y = lin(x, p["w_in"], p["b_in"])
    y = y + jnp.tanh(lin(jnp.tanh(lin(y, p["w2"], p["b2"])), p["w3"], p["b3"]))
    y = y + jnp.tanh(lin(jnp.tanh(lin(y, p["w4"], p["b4"])), p["w5"], p["b5"]))
    y = y + jnp.tanh(lin(jnp.tanh(lin(y, p["w6"], p["b6"])), p["w7"], p["b7"]))
    return lin(y, p["w_out"], p["b_out"])


if __name__ == "__main__":
    key = jax.random.PRNGKey(0)
    k_x, k_p = jax.random.split(key)

    input_dim, output_dim, m = 3, 1, 20
    params = init_params(k_p, input_dim=input_dim, output_dim=output_dim, m=m)

    # Multi-tile path: 1000 collocation points -> padded to 1024 lanes,
    # 2 grid steps of 512 (exercises pipelining, megacore split, tail slice).
    batch = 1000
    x = jax.random.normal(k_x, (batch, input_dim), jnp.float32)
    out = jax.block_until_ready(deep_ritz_net(x, params))
    ref = deep_ritz_net_ref(x, params)
    assert out.shape == (batch, output_dim)
    assert jnp.allclose(out, ref, atol=1e-5, rtol=1e-5)

    # Tiny-batch path: single 128-lane tile, padded tail sliced off.
    x_small = x[:8]
    out_small = jax.block_until_ready(deep_ritz_net(x_small, params))
    assert out_small.shape == (8, output_dim)
    assert jnp.allclose(out_small, deep_ritz_net_ref(x_small, params),
                        atol=1e-5, rtol=1e-5)

    print("KERNEL_OK")
</pallas_src>

<mosaic_0001>
module attributes {stable_mosaic.version = 11 : i64} {
  func.func @deepritz_kernel(%arg0: i32, %arg1: memref<3x512xf32, #tpu.memory_space<vmem>>, %arg2: memref<20x3xf32, #tpu.memory_space<vmem>>, %arg3: memref<20x1xf32, #tpu.memory_space<vmem>>, %arg4: memref<6x20x20xf32, #tpu.memory_space<vmem>>, %arg5: memref<6x20x1xf32, #tpu.memory_space<vmem>>, %arg6: memref<1x20xf32, #tpu.memory_space<vmem>>, %arg7: memref<1x1xf32, #tpu.memory_space<vmem>>, %arg8: memref<1x512xf32, #tpu.memory_space<vmem>>) attributes {dimension_semantics = [#tpu.dimension_semantics<parallel>], iteration_bounds = array<i64: 2>, scalar_prefetch = 0 : i64, scratch_operands = 0 : i64, tpu.core_type = #tpu.core_type<tc>, window_params = [{transform_indices = @transform_0, window_bounds = array<i64: 3, 512>}, {pipeline_mode = #tpu.pipeline_mode<synchronous>, transform_indices = @transform_1, window_bounds = array<i64: 20, 3>}, {pipeline_mode = #tpu.pipeline_mode<synchronous>, transform_indices = @transform_2, window_bounds = array<i64: 20, 1>}, {pipeline_mode = #tpu.pipeline_mode<synchronous>, transform_indices = @transform_3, window_bounds = array<i64: 6, 20, 20>}, {pipeline_mode = #tpu.pipeline_mode<synchronous>, transform_indices = @transform_4, window_bounds = array<i64: 6, 20, 1>}, {pipeline_mode = #tpu.pipeline_mode<synchronous>, transform_indices = @transform_5, window_bounds = array<i64: 1, 20>}, {pipeline_mode = #tpu.pipeline_mode<synchronous>, transform_indices = @transform_6, window_bounds = array<i64: 1, 1>}, {transform_indices = @transform_7, window_bounds = array<i64: 1, 512>}]} {
    %c0 = arith.constant 0 : index
    %c0_0 = arith.constant 0 : index
    %0 = vector.load %arg1[%c0, %c0_0] : memref<3x512xf32, #tpu.memory_space<vmem>>, vector<3x512xf32>
    %c0_1 = arith.constant 0 : index
    %c0_2 = arith.constant 0 : index
    %1 = vector.load %arg2[%c0_1, %c0_2] : memref<20x3xf32, #tpu.memory_space<vmem>>, vector<20x3xf32>
    %c0_3 = arith.constant 0 : index
    %c0_4 = arith.constant 0 : index
    %2 = vector.load %arg3[%c0_3, %c0_4] : memref<20x1xf32, #tpu.memory_space<vmem>>, vector<20x1xf32>
    %cst = arith.constant dense<0.000000e+00> : vector<20x512xf32>
    %3 = tpu.matmul %1, %0, %cst {dimension_numbers = #tpu.dot_dimension_numbers<[1], [0], [0], [1], [0, 0, 1, 1], [], []>} : vector<20x3xf32>, vector<3x512xf32>, vector<20x512xf32> -> vector<20x512xf32>
    %4 = vector.broadcast %2 : vector<20x1xf32> to vector<20x512xf32>
    %5 = arith.addf %3, %4 : vector<20x512xf32>
    %c0_5 = arith.constant 0 : index
    %c0_6 = arith.constant 0 : index
    %c0_7 = arith.constant 0 : index
    %6 = vector.load %arg4[%c0_5, %c0_6, %c0_7] : memref<6x20x20xf32, #tpu.memory_space<vmem>>, vector<1x20x20xf32>
    %7 = vector.shape_cast %6 : vector<1x20x20xf32> to vector<20x20xf32>
    %c0_8 = arith.constant 0 : index
    %c0_9 = arith.constant 0 : index
    %c0_10 = arith.constant 0 : index
    %8 = vector.load %arg5[%c0_8, %c0_9, %c0_10] : memref<6x20x1xf32, #tpu.memory_space<vmem>>, vector<1x20x1xf32>
    %9 = vector.shape_cast %8 : vector<1x20x1xf32> to vector<20x1xf32>
    %c1 = arith.constant 1 : index
    %c0_11 = arith.constant 0 : index
    %c0_12 = arith.constant 0 : index
    %10 = vector.load %arg4[%c1, %c0_11, %c0_12] : memref<6x20x20xf32, #tpu.memory_space<vmem>>, vector<1x20x20xf32>
    %11 = vector.shape_cast %10 : vector<1x20x20xf32> to vector<20x20xf32>
    %c1_13 = arith.constant 1 : index
    %c0_14 = arith.constant 0 : index
    %c0_15 = arith.constant 0 : index
    %12 = vector.load %arg5[%c1_13, %c0_14, %c0_15] : memref<6x20x1xf32, #tpu.memory_space<vmem>>, vector<1x20x1xf32>
    %13 = vector.shape_cast %12 : vector<1x20x1xf32> to vector<20x1xf32>
    %cst_16 = arith.constant dense<0.000000e+00> : vector<20x512xf32>
    %14 = tpu.matmul %7, %5, %cst_16 {dimension_numbers = #tpu.dot_dimension_numbers<[1], [0], [0], [1], [0, 0, 1, 1], [], []>} : vector<20x20xf32>, vector<20x512xf32>, vector<20x512xf32> -> vector<20x512xf32>
    %15 = vector.broadcast %9 : vector<20x1xf32> to vector<20x512xf32>
    %16 = arith.addf %14, %15 : vector<20x512xf32>
    %17 = math.tanh %16 : vector<20x512xf32>
    %cst_17 = arith.constant dense<0.000000e+00> : vector<20x512xf32>
    %18 = tpu.matmul %11, %17, %cst_17 {dimension_numbers = #tpu.dot_dimension_numbers<[1], [0], [0], [1], [0, 0, 1, 1], [], []>} : vector<20x20xf32>, vector<20x512xf32>, vector<20x512xf32> -> vector<20x512xf32>
    %19 = vector.broadcast %13 : vector<20x1xf32> to vector<20x512xf32>
    %20 = arith.addf %18, %19 : vector<20x512xf32>
    %21 = math.tanh %20 : vector<20x512xf32>
    %22 = arith.addf %5, %21 : vector<20x512xf32>
    %c2 = arith.constant 2 : index
    %c0_18 = arith.constant 0 : index
    %c0_19 = arith.constant 0 : index
    %23 = vector.load %arg4[%c2, %c0_18, %c0_19] : memref<6x20x20xf32, #tpu.memory_space<vmem>>, vector<1x20x20xf32>
    %24 = vector.shape_cast %23 : vector<1x20x20xf32> to vector<20x20xf32>
    %c2_20 = arith.constant 2 : index
    %c0_21 = arith.constant 0 : index
    %c0_22 = arith.constant 0 : index
    %25 = vector.load %arg5[%c2_20, %c0_21, %c0_22] : memref<6x20x1xf32, #tpu.memory_space<vmem>>, vector<1x20x1xf32>
    %26 = vector.shape_cast %25 : vector<1x20x1xf32> to vector<20x1xf32>
    %c3 = arith.constant 3 : index
    %c0_23 = arith.constant 0 : index
    %c0_24 = arith.constant 0 : index
    %27 = vector.load %arg4[%c3, %c0_23, %c0_24] : memref<6x20x20xf32, #tpu.memory_space<vmem>>, vector<1x20x20xf32>
    %28 = vector.shape_cast %27 : vector<1x20x20xf32> to vector<20x20xf32>
    %c3_25 = arith.constant 3 : index
    %c0_26 = arith.constant 0 : index
    %c0_27 = arith.constant 0 : index
    %29 = vector.load %arg5[%c3_25, %c0_26, %c0_27] : memref<6x20x1xf32, #tpu.memory_space<vmem>>, vector<1x20x1xf32>
    %30 = vector.shape_cast %29 : vector<1x20x1xf32> to vector<20x1xf32>
    %cst_28 = arith.constant dense<0.000000e+00> : vector<20x512xf32>
    %31 = tpu.matmul %24, %22, %cst_28 {dimension_numbers = #tpu.dot_dimension_numbers<[1], [0], [0], [1], [0, 0, 1, 1], [], []>} : vector<20x20xf32>, vector<20x512xf32>, vector<20x512xf32> -> vector<20x512xf32>
    %32 = vector.broadcast %26 : vector<20x1xf32> to vector<20x512xf32>
    %33 = arith.addf %31, %32 : vector<20x512xf32>
    %34 = math.tanh %33 : vector<20x512xf32>
    %cst_29 = arith.constant dense<0.000000e+00> : vector<20x512xf32>
    %35 = tpu.matmul %28, %34, %cst_29 {dimension_numbers = #tpu.dot_dimension_numbers<[1], [0], [0], [1], [0, 0, 1, 1], [], []>} : vector<20x20xf32>, vector<20x512xf32>, vector<20x512xf32> -> vector<20x512xf32>
    %36 = vector.broadcast %30 : vector<20x1xf32> to vector<20x512xf32>
    %37 = arith.addf %35, %36 : vector<20x512xf32>
    %38 = math.tanh %37 : vector<20x512xf32>
    %39 = arith.addf %22, %38 : vector<20x512xf32>
    %c4 = arith.constant 4 : index
    %c0_30 = arith.constant 0 : index
    %c0_31 = arith.constant 0 : index
    %40 = vector.load %arg4[%c4, %c0_30, %c0_31] : memref<6x20x20xf32, #tpu.memory_space<vmem>>, vector<1x20x20xf32>
    %41 = vector.shape_cast %40 : vector<1x20x20xf32> to vector<20x20xf32>
    %c4_32 = arith.constant 4 : index
    %c0_33 = arith.constant 0 : index
    %c0_34 = arith.constant 0 : index
    %42 = vector.load %arg5[%c4_32, %c0_33, %c0_34] : memref<6x20x1xf32, #tpu.memory_space<vmem>>, vector<1x20x1xf32>
    %43 = vector.shape_cast %42 : vector<1x20x1xf32> to vector<20x1xf32>
    %c5 = arith.constant 5 : index
    %c0_35 = arith.constant 0 : index
    %c0_36 = arith.constant 0 : index
    %44 = vector.load %arg4[%c5, %c0_35, %c0_36] : memref<6x20x20xf32, #tpu.memory_space<vmem>>, vector<1x20x20xf32>
    %45 = vector.shape_cast %44 : vector<1x20x20xf32> to vector<20x20xf32>
    %c5_37 = arith.constant 5 : index
    %c0_38 = arith.constant 0 : index
    %c0_39 = arith.constant 0 : index
    %46 = vector.load %arg5[%c5_37, %c0_38, %c0_39] : memref<6x20x1xf32, #tpu.memory_space<vmem>>, vector<1x20x1xf32>
    %47 = vector.shape_cast %46 : vector<1x20x1xf32> to vector<20x1xf32>
    %cst_40 = arith.constant dense<0.000000e+00> : vector<20x512xf32>
    %48 = tpu.matmul %41, %39, %cst_40 {dimension_numbers = #tpu.dot_dimension_numbers<[1], [0], [0], [1], [0, 0, 1, 1], [], []>} : vector<20x20xf32>, vector<20x512xf32>, vector<20x512xf32> -> vector<20x512xf32>
    %49 = vector.broadcast %43 : vector<20x1xf32> to vector<20x512xf32>
    %50 = arith.addf %48, %49 : vector<20x512xf32>
    %51 = math.tanh %50 : vector<20x512xf32>
    %cst_41 = arith.constant dense<0.000000e+00> : vector<20x512xf32>
    %52 = tpu.matmul %45, %51, %cst_41 {dimension_numbers = #tpu.dot_dimension_numbers<[1], [0], [0], [1], [0, 0, 1, 1], [], []>} : vector<20x20xf32>, vector<20x512xf32>, vector<20x512xf32> -> vector<20x512xf32>
    %53 = vector.broadcast %47 : vector<20x1xf32> to vector<20x512xf32>
    %54 = arith.addf %52, %53 : vector<20x512xf32>
    %55 = math.tanh %54 : vector<20x512xf32>
    %56 = arith.addf %39, %55 : vector<20x512xf32>
    %c0_42 = arith.constant 0 : index
    %c0_43 = arith.constant 0 : index
    %57 = vector.load %arg6[%c0_42, %c0_43] : memref<1x20xf32, #tpu.memory_space<vmem>>, vector<1x20xf32>
    %c0_44 = arith.constant 0 : index
    %c0_45 = arith.constant 0 : index
    %58 = vector.load %arg7[%c0_44, %c0_45] : memref<1x1xf32, #tpu.memory_space<vmem>>, vector<1x1xf32>
    %cst_46 = arith.constant dense<0.000000e+00> : vector<1x512xf32>
    %59 = tpu.matmul %57, %56, %cst_46 {dimension_numbers = #tpu.dot_dimension_numbers<[1], [0], [0], [1], [0, 0, 1, 1], [], []>} : vector<1x20xf32>, vector<20x512xf32>, vector<1x512xf32> -> vector<1x512xf32>
    %60 = vector.broadcast %58 : vector<1x1xf32> to vector<1x512xf32>
    %61 = arith.addf %59, %60 : vector<1x512xf32>
    %c0_47 = arith.constant 0 : index
    %c0_48 = arith.constant 0 : index
    %62 = vector.load %arg8[%c0_47, %c0_48] : memref<1x512xf32, #tpu.memory_space<vmem>>, vector<1x512xf32>
    tpu.vector_store %arg8[%c0_47, %c0_48], %61 {strides = array<i32>} : memref<1x512xf32, #tpu.memory_space<vmem>>, vector<1x512xf32>,
    return
  }
  func.func @transform_0(%arg0: i32) -> (i32, i32) {
    %c0_i32 = arith.constant 0 : i32
    %c0_i32_0 = arith.constant 0 : i32
    return %c0_i32, %arg0 : i32, i32
  }
  func.func @transform_1(%arg0: i32) -> (i32, i32) {
    %c0_i32 = arith.constant 0 : i32
    %c0_i32_0 = arith.constant 0 : i32
    %c0_i32_1 = arith.constant 0 : i32
    return %c0_i32, %c0_i32_0 : i32, i32
  }
  func.func @transform_2(%arg0: i32) -> (i32, i32) {
    %c0_i32 = arith.constant 0 : i32
    %c0_i32_0 = arith.constant 0 : i32
    %c0_i32_1 = arith.constant 0 : i32
    return %c0_i32, %c0_i32_0 : i32, i32
  }
  func.func @transform_3(%arg0: i32) -> (i32, i32, i32) {
    %c0_i32 = arith.constant 0 : i32
    %c0_i32_0 = arith.constant 0 : i32
    %c0_i32_1 = arith.constant 0 : i32
    %c0_i32_2 = arith.constant 0 : i32
    return %c0_i32, %c0_i32_0, %c0_i32_1 : i32, i32, i32
  }
  func.func @transform_4(%arg0: i32) -> (i32, i32, i32) {
    %c0_i32 = arith.constant 0 : i32
    %c0_i32_0 = arith.constant 0 : i32
    %c0_i32_1 = arith.constant 0 : i32
    %c0_i32_2 = arith.constant 0 : i32
    return %c0_i32, %c0_i32_0, %c0_i32_1 : i32, i32, i32
  }
  func.func @transform_5(%arg0: i32) -> (i32, i32) {
    %c0_i32 = arith.constant 0 : i32
    %c0_i32_0 = arith.constant 0 : i32
    %c0_i32_1 = arith.constant 0 : i32
    return %c0_i32, %c0_i32_0 : i32, i32
  }
  func.func @transform_6(%arg0: i32) -> (i32, i32) {
    %c0_i32 = arith.constant 0 : i32
    %c0_i32_0 = arith.constant 0 : i32
    %c0_i32_1 = arith.constant 0 : i32
    return %c0_i32, %c0_i32_0 : i32, i32
  }
  func.func @transform_7(%arg0: i32) -> (i32, i32) {
    %c0_i32 = arith.constant 0 : i32
    %c0_i32_0 = arith.constant 0 : i32
    return %c0_i32, %arg0 : i32, i32
  }
}

</mosaic_0001>

<bundles_post_ra>
// kernel: tpu_custom_call.1
= control target key start
LH: loop header
LB: loop body
LE: loop exit
PB: predicated region body
PF: predicated region fallthrough
CT: control target
= control target key end

     0   :  { %s3102_s0 = inlined_call_operand.vmem [shape: f32[3,1024], index: 0, kind: input, shape index: {}]   ;;  %s3103_s1 = inlined_call_operand.vmem [shape: f32[20,3], index: 1, kind: input, shape index: {}]   ;;  %s3104_s2 = inlined_call_operand.vmem [shape: f32[20,1], index: 2, kind: input, shape index: {}]   ;;  %s3105_s3 = inlined_call_operand.vmem [shape: f32[6,20,20], index: 3, kind: input, shape index: {}]   ;;  %s3106_s4 = inlined_call_operand.vmem [shape: f32[6,20,1], index: 4, kind: input, shape index: {}]   ;;  %s3107_s5 = inlined_call_operand.vmem [shape: f32[1,20], index: 5, kind: input, shape index: {}]   ;;  %s3108_s6 = inlined_call_operand.<no memory space> [shape: f32[1,1], index: 6, kind: input, shape index: {}]   ;;  %s3109_s7 = inlined_call_operand.hbm [shape: f32[1,1024], index: 7, kind: output, shape index: {}]  }
   0x1   :  { %v12_v0 = vstv %s3108_s6 }
   0x2   :  { %13 = vst [vmem:[#allocation2] sm:$0x1] %v12_v0 }
   0x3   :  { %14 = vsyncpa [#allocation4], 0 }
   0x4   :  { %16 = vsyncpa [#allocation4 + $0x1], 0  ;;  %s2614_s26 = smov 0   ;;  %s2616_s27 = smov 0  }
   0x5   :  { %s2618_s28 = smov 0   ;;  %s2620_s29 = smov 0  }
   0x6 LB: > { %s2635_s6 = sadd.s32 4294967295, %s2565_s29   ;;  %s2138_s30 = sadd.s32 4294967294, %s2565_s29   ;;  %s2565_s29 = sphi %s2620_s29, %s3115_s29   ;;  %s2561_s28 = sphi %s2618_s28, %s3114_s28   ;;  %s2557_s27 = sphi %s2616_s27, %s3113_s27   ;;  %s2553_s26 = sphi %s2614_s26, %s3112_s26  }
   0x7   : > { %s2639_s8 = sadd.s32 1, %s2565_s29   ;;  %s181_s9 = sadd.s32 1, %s2561_s28 }
   0x8   : > { %s178_s10 = ssub.s32 %s2565_s29, %s2639_s8  ;;  %p191_p0 = scmp.ne.s32.totalorder %s2561_s28, %s2557_s27 }
   0x9   : > { %p179_p1 = scmp.eq.s32.totalorder %s178_s10, 0  ;;  %p192_p2 = scmp.eq.s32.totalorder %s2635_s6, 1 }
   0xa   : > { %p197_p3 = scmp.ne.s32.totalorder %s2557_s27, %s2553_s26  ;;  %p198_p4 = scmp.eq.s32.totalorder %s2138_s30, 1 }
   0xb   : > { %s2650_s11 = scalar_select %p179_p1, %s2561_s28, %s181_s9  }
   0xc   : > { %p2652_p5 = por %p192_p2, %p191_p0  ;;  %p2656_p6 = por %p198_p4, %p197_p3 }
   0xd   : > { %p2141_p7 = scmp.ge.s32.totalorder %s2565_s29, 1  ;;  %p243_p8 = scmp.lt.s32.totalorder %s2565_s29, 3 }
   0xf   : > { %p244_p9 = pnand %p2141_p7, %p243_p8 }
  0x10   : > { %s2143_s14 = sshll.u32 (!%p244_p9), %s2635_s6, 2  ;;  %v2567_v1 = vmov (!%p244_p9), 0.0   ;;  %v287_v2 = vld [vmem:[%s3104_s2] sm:$0xff] (!%p244_p9)  ;;  %v2568_v3 = vmov (!%p244_p9), 0   ;;  %v289_v4 = vld [vmem:[%s3104_s2 + $0x10] sm:$0xf] (!%p244_p9) }
  0x11   : > { %247 = sbr.rel (%p244_p9) target bundleno = 1937 (0x791), region = 48  ;;  %p276_p10 = scmp.lt.s32.totalorder (!%p244_p9), %s2143_s14, 7  ;;  %392 = vmatprep.mubr.f32.mxu0 (!%p244_p9), %v2567_v1  ;;  %475 = vmatprep.mubr.f32.mxu1 (!%p244_p9), %v2567_v1  ;;  %v288_v5 = vld [vmem:[%s3104_s2 + $0x8] sm:$0xff] (!%p244_p9)  ;;  %v497_v6 = vld [vmem:[%s3106_s4] sm:$0xff] (!%p244_p9)  ;;  %vm319_vm0 = vcmask (!%p244_p9), 1042432   ;;  %vm309_vm1 = vcmask (!%p244_p9), 23552  }
  0x12   : > { %2355 = vset.pattern.permute.xlu0 (!%p244_p9), %v2568_v3  ;;  %2356 = vset.pattern.permute.xlu1 (!%p244_p9), %v2568_v3  ;;  %v284_v11 = vld [vmem:[%s3103_s1] sm:$0xff] (!%p244_p9)  ;;  %v498_v12 = vld [vmem:[%s3106_s4 + $0x8] sm:$0xff] (!%p244_p9)  ;;  %v499_v13 = vld [vmem:[%s3106_s4 + $0x10] sm:$0xf] (!%p244_p9)  ;;  %vm533_vm2 = vcmask (!%p244_p9), 1043456   ;;  %vm523_vm3 = vcmask (!%p244_p9), 162816  }
  0x13   : > { %292 = vperm.xlu0 (!%p244_p9), %2355, %v287_v2   ;;  %302 = vperm.xlu1 (!%p244_p9), %2356, %v289_v4   ;;  %v285_v14 = vld [vmem:[%s3103_s1 + $0x8] sm:$0xff] (!%p244_p9)  ;;  %v2158_v15 = vld [vmem:[%s3106_s4 + $0x18] sm:$0xff] (!%p244_p9)  ;;  %v2159_v16 = vld [vmem:[%s3106_s4 + $0x20] sm:$0xff] (!%p244_p9)  ;;  %s272_s15 = sand.u32 (!%p244_p9), 1, %s2557_s27   ;;  %s2256_s17 = sshll.u32 (!%p244_p9), %s2635_s6, 6 }
  0x14   : > { %v286_v17 = vld [vmem:[%s3103_s1 + $0x10] sm:$0xf] (!%p244_p9)  ;;  %v2160_v18 = vld [vmem:[%s3106_s4 + $0x28] sm:$0xf] (!%p244_p9)  ;;  %v2185_v20 = vld [vmem:[%s3106_s4 + $0x38] sm:$0xff] (!%p244_p9)  ;;  %s2142_s16 = sshll.u32 (!%p244_p9), %s272_s15, 2  ;;  %s3060_s22 = scalar_lea.hbm (!%p244_p9), %s3109_s7, %s2256_s17 }
  0x15   : > { %v2184_v19 = vld [vmem:[%s3106_s4 + $0x30] sm:$0xff] (!%p244_p9)  ;;  %v2186_v21 = vld [vmem:[%s3106_s4 + $0x40] sm:$0xf] (!%p244_p9)  ;;  %v2190_v22 = vld [vmem:[%s3106_s4 + $0x48] sm:$0xff] (!%p244_p9)  ;;  %s274_s18 = scalar_lea.vmem (!%p244_p9), [#allocation3], %s2142_s16  ;;  %s2570_s6 = smov (!%p244_p9), [#allocation3]  }
  0x16   : > { %v2191_v23 = vld [vmem:[%s3106_s4 + $0x50] sm:$0xff] (!%p244_p9)  ;;  %v2192_v24 = vld [vmem:[%s3106_s4 + $0x58] sm:$0xf] (!%p244_p9)  ;;  %v2216_v25 = vld [vmem:[%s3106_s4 + $0x60] sm:$0xff] (!%p244_p9)  ;;  %s2079_s19 = sshll.u32 (!%p244_p9), %s274_s18, 4  ;;  %s2507_s25 = sshll.u32 (!%p244_p9), %s2570_s6, 4  ;;  %s3062_s19 = int_to_ptr.vmem [resolvable:$true] %s2079_s19  ;;  %s2508_s25 = int_to_ptr.vmem [resolvable:$false] %s2507_s25 }
  0x17   : > { %297 = vperm.xlu0 (!%p244_p9), %2355, %v288_v5   ;;  %510 = vperm.xlu1 (!%p244_p9), %2356, %v497_v6   ;;  %v2217_v26 = vld [vmem:[%s3106_s4 + $0x68] sm:$0xff] (!%p244_p9)  ;;  %v2218_v27 = vld [vmem:[%s3106_s4 + $0x70] sm:$0xf] (!%p244_p9)  ;;  %v2222_v28 = vld [vmem:[%s3106_s4 + $0x78] sm:$0xff] (!%p244_p9)  ;;  %s2503_s24 = scalar_lea.vmem (!%p244_p9), %s3062_s19, 64  ;;  %p2510_p0 = scmp.lt.s32.totalorder (!%p244_p9), %s3062_s19, %s2508_s25 }
  0x18   : > { %s3117_s14 = smov (!%p276_p10, %s2143_s14), 7  ;;  %v2223_v29 = vld [vmem:[%s3106_s4 + $0x80] sm:$0xff]  ;;  %v2224_v30 = vld [vmem:[%s3106_s4 + $0x88] sm:$0xf]  ;;  %v496_v2 = vld [vmem:[%s3105_s3 + $0x10] sm:$0xf]  ;;  %p2504_p11 = scmp.ne.s32.totalorder %s3062_s19, %s2503_s24 }
  0x19   : > { %s2144_s23 = sshll.u32 %s3117_s14, 2  ;;  %v1863_v31 = vld [vmem:[#allocation2] sm:$0x1]  ;;  %v495_v0 = vld [vmem:[%s3105_s3 + $0x8] sm:$0xff] }
  0x1a   : > { %s279_s30 = scalar_lea.vmem %s3102_s0, %s2144_s23  ;;  %v494_v63 = vld [vmem:[%s3105_s3] sm:$0xff]  ;;  %s2065_s23 = scalar_lea.sflag [#allocation4], %s272_s15 }
  0x1b   : > { %v282_v7 = vld [vmem:[%s279_s30] sm:$0x77]  ;;  %v283_v8 = vld [vmem:[%s279_s30 + $0x8] sm:$0x77]  ;;  %515 = vperm.xlu0 %2355, %v498_v12   ;;  %520 = vperm.xlu1 %2356, %v499_v13   ;;  %p2505_p12 = pnand %p2504_p11, %p2652_p5  ;;  %s2509_s30 = scalar_lea.vmem %s2508_s25, 128 }
  0x1c   : > { %v307_v9 = vcombine.high %v282_v7, %v282_v7  ;;  %v308_v10 = vcombine.high %v283_v8, %v283_v8  ;;  %p2511_p1 = scmp.lt.s32.totalorder %s2509_s30, %s2503_s24 }
  0x1d   : > { %p2506_p13 = pneg %p2505_p12 }
  0x1e   : > { %2145 = vmatprep.subr.msk.mxu0 %vm319_vm0, %v307_v9  ;;  %2150 = vmatprep.subr.msk.mxu1 %vm319_vm0, %v308_v10  ;;  %p2512_p2 = por %p2511_p1, %p2510_p0 }
  0x1f   : > { %2146 = vmatpush1.msk.msra.mxu0 %vm319_vm0, %v282_v7  ;;  %2151 = vmatpush1.msk.msra.mxu1 %vm319_vm0, %v283_v8 }
  0x20   : > { %2147 = vmatmul.mubr.msk.f32.vlgmr.msra.gmra.mrb[0].mxu0 %vm309_vm1, %v284_v11  ;;  %2152 = vmatmul.mubr.msk.f32.vlgmr.msra.gmra.mrb[0].mxu1 %vm309_vm1, %v284_v11  ;;  %p2513_p3 = pnand %p2512_p2, %p2506_p13 }
  0x21   : > { %398 = vmatprep.mubr.f32.mxu0 %v2567_v1  ;;  %481 = vmatprep.mubr.f32.mxu1 %v2567_v1 }
  0x22   : > { %726 = vperm.xlu0 %2355, %v2158_v15   ;;  %731 = vperm.xlu1 %2356, %v2159_v16  }
  0x24   : > { %2148 = vmatmul.mubr.msk.f32.gmra.mrb[2].mxu0 %vm309_vm1, %v285_v14  ;;  %2153 = vmatmul.mubr.msk.f32.gmra.mrb[2].mxu1 %vm309_vm1, %v285_v14 }
  0x25   : > { %404 = vmatprep.mubr.f32.mxu0 %v2567_v1  ;;  %487 = vmatprep.mubr.f32.mxu1 %v2567_v1 }
  0x26   : > { %736 = vperm.xlu0 %2355, %v2160_v18   ;;  %968 = vperm.xlu1 %2356, %v2184_v19  }
  0x28   : > { %2149 = vmatmul.mubr.msk.f32.gmra.mrb[4].mxu0 %vm309_vm1, %v286_v17  ;;  %2154 = vmatmul.mubr.msk.f32.gmra.mrb[4].mxu1 %vm309_vm1, %v286_v17 }
  0x29   : > { %610 = vmatprep.mubr.f32.mxu0 %v2567_v1  ;;  %693 = vmatprep.mubr.f32.mxu1 %v2567_v1 }
  0x2a   : > { %973 = vperm.xlu0 %2355, %v2185_v20   ;;  %978 = vperm.xlu1 %2356, %v2186_v21  }
  0x2e   : > { %1182 = vperm.xlu0 %2355, %v2190_v22   ;;  %1187 = vperm.xlu1 %2356, %v2191_v23  }
  0x32   : > { %1192 = vperm.xlu0 %2355, %v2192_v24   ;;  %1424 = vperm.xlu1 %2356, %v2216_v25  }
  0x36   : > { %1429 = vperm.xlu0 %2355, %v2217_v26   ;;  %1434 = vperm.xlu1 %2356, %v2218_v27  }
  0x3a   : > { %1638 = vperm.xlu0 %2355, %v2222_v28   ;;  %1643 = vperm.xlu1 %2356, %v2223_v29  }
  0x3e   : > { %1648 = vperm.xlu0 %2355, %v2224_v30   ;;  %1866 = vperm.xlu1 %2356, %v1863_v31  }
  0x92   : > { %v293_v32 = vpop.permute.xlu0 %292  ;;  %v303_v48 = vpop.permute.xlu1 %302 }
  0x96   : > { %v298_v37 = vpop.permute.xlu0 %297  ;;  %v511_v3 = vpop.permute.xlu1 %510 }
  0x9a   : > { %v516_v12 = vpop.permute.xlu0 %515  ;;  %v521_v21 = vpop.permute.xlu1 %520 }
  0xf3   : > { %v394_v33 = vpop.f32.mrb[0].mxu0  ;;  %v477_v34 = vpop.f32.mrb[0].mxu1 }
  0xf4   : > { %v396_v35 = vpop.f32.mrb[1].mxu0  ;;  %v479_v36 = vpop.f32.mrb[1].mxu1  ;;  %v2764_v49 = vadd.f32 %v394_v33, %v293_v32  ;;  %v2766_v50 = vadd.f32 %v477_v34, %v293_v32 }
  0xf5   : > { %v2756_v44 = vadd.f32 %v396_v35, %v293_v32  ;;  %v2758_v45 = vadd.f32 %v479_v36, %v293_v32 }
  0xf7   : > { %v400_v38 = vpop.f32.mrb[2].mxu0  ;;  %v483_v39 = vpop.f32.mrb[2].mxu1 }
  0xf8   : > { %v2752_v40 = vadd.f32 %v400_v38, %v298_v37  ;;  %v2754_v41 = vadd.f32 %v483_v39, %v298_v37  ;;  %v402_v42 = vpop.f32.mrb[3].mxu0  ;;  %v485_v43 = vpop.f32.mrb[3].mxu1 }
  0xf9   : > { %v2760_v46 = vadd.f32 %v402_v42, %v298_v37  ;;  %v2762_v47 = vadd.f32 %v485_v43, %v298_v37 }
  0xfa   : > { %v2259_v55 = vpack.c.bf16 %v2752_v40, %v2764_v49  ;;  %v2263_v56 = vpack.c.bf16 %v2754_v41, %v2766_v50 }
  0xfb   : > { %v2257_v51 = vpack.c.bf16 %v2760_v46, %v2756_v44  ;;  %v2261_v52 = vpack.c.bf16 %v2762_v47, %v2758_v45  ;;  %v406_v53 = vpop.f32.mrb[4].mxu0  ;;  %v489_v54 = vpop.f32.mrb[4].mxu1 }
  0xfc   : > { %v408_v57 = vpop.f32.mrb[5].mxu0  ;;  %v491_v58 = vpop.f32.mrb[5].mxu1  ;;  %v2784_v61 = vadd.f32 %v406_v53, %v303_v48  ;;  %v2786_v62 = vadd.f32 %v489_v54, %v303_v48 }
  0xfd   : > { %v2776_v59 = vadd.f32 %v408_v57, %v303_v48  ;;  %v2778_v60 = vadd.f32 %v491_v58, %v303_v48  ;;  %2258 = vmatprep.subr.bf16.mxu0 %v2257_v51  ;;  %2262 = vmatprep.subr.bf16.mxu1 %v2261_v52  ;;  %v2155_v52 = vld [vmem:[%s3105_s3 + $0x18] sm:$0xff]  ;;  %v727_v57 = vpop.permute.xlu0 %726 }
  0xfe   : > { %2260 = vmatpush1.bf16.msra.mxu0 %v2259_v55  ;;  %2264 = vmatpush1.bf16.msra.mxu1 %v2263_v56  ;;  %v2156_v55 = vld [vmem:[%s3105_s3 + $0x20] sm:$0xff]  ;;  %v2157_v56 = vld [vmem:[%s3105_s3 + $0x28] sm:$0xf] }
  0xff   : > { %2161 = vmatprep.subr.msk.mxu0 %vm533_vm2, %v2776_v59  ;;  %2166 = vmatprep.subr.msk.mxu1 %vm533_vm2, %v2778_v60 }
 0x102   : > { %2162 = vmatpush1.msk.msra.mxu0 %vm533_vm2, %v2784_v61  ;;  %2167 = vmatpush1.msk.msra.mxu1 %vm533_vm2, %v2786_v62 }
 0x103   : > { %2163 = vmatmul.mubr.msk.f32.vlgmr.msra.gmra.mrb[6].mxu0 %vm523_vm3, %v494_v63  ;;  %2168 = vmatmul.mubr.msk.f32.vlgmr.msra.gmra.mrb[6].mxu1 %vm523_vm3, %v494_v63 }
 0x104   : > { %616 = vmatprep.mubr.f32.mxu0 %v2567_v1  ;;  %699 = vmatprep.mubr.f32.mxu1 %v2567_v1 }
 0x107   : > { %2164 = vmatmul.mubr.msk.f32.gmra.mrb[8].mxu0 %vm523_vm3, %v495_v0  ;;  %2169 = vmatmul.mubr.msk.f32.gmra.mrb[8].mxu1 %vm523_vm3, %v495_v0 }
 0x108   : > { %622 = vmatprep.mubr.f32.mxu0 %v2567_v1  ;;  %705 = vmatprep.mubr.f32.mxu1 %v2567_v1 }
 0x10b   : > { %2165 = vmatmul.mubr.msk.f32.gmra.mrb[10].mxu0 %vm523_vm3, %v496_v2  ;;  %2170 = vmatmul.mubr.msk.f32.gmra.mrb[10].mxu1 %vm523_vm3, %v496_v2 }
 0x10c   : > { %824 = vmatprep.mubr.f32.mxu0 %v2567_v1  ;;  %907 = vmatprep.mubr.f32.mxu1 %v2567_v1 }
 0x1d6   : > { %v612_v4 = vpop.f32.mrb[6].mxu0  ;;  %v695_v5 = vpop.f32.mrb[6].mxu1 }
 0x1d7   : > { %v613_v6 = vadd.f32 %v612_v4, %v511_v3  ;;  %v696_v7 = vadd.f32 %v695_v5, %v511_v3  ;;  %v614_v8 = vpop.f32.mrb[7].mxu0  ;;  %v697_v9 = vpop.f32.mrb[7].mxu1 }
 0x1d8   : > { %v615_v10 = vadd.f32 %v614_v8, %v511_v3  ;;  %v698_v11 = vadd.f32 %v697_v9, %v511_v3 }
 0x1d9   : > { %2359 = vtanh.f32 %v613_v6 }
 0x1da   : > { %2361 = vtanh.f32 %v696_v7  ;;  %v618_v13 = vpop.f32.mrb[8].mxu0  ;;  %v701_v14 = vpop.f32.mrb[8].mxu1 }
 0x1db   : > { %2363 = vtanh.f32 %v615_v10  ;;  %v619_v15 = vadd.f32 %v618_v13, %v516_v12  ;;  %v702_v16 = vadd.f32 %v701_v14, %v516_v12  ;;  %v620_v17 = vpop.f32.mrb[9].mxu0  ;;  %v703_v18 = vpop.f32.mrb[9].mxu1 }
 0x1dc   : > { %2365 = vtanh.f32 %v698_v11  ;;  %v621_v19 = vadd.f32 %v620_v17, %v516_v12  ;;  %v704_v20 = vadd.f32 %v703_v18, %v516_v12  ;;  %v732_v7 = vpop.permute.xlu1 %731 }
 0x1dd   : > { %2367 = vtanh.f32 %v619_v15 }
 0x1de   : > { %2369 = vtanh.f32 %v702_v16  ;;  %v624_v22 = vpop.f32.mrb[10].mxu0  ;;  %v707_v23 = vpop.f32.mrb[10].mxu1 }
 0x1df   : > { %2371 = vtanh.f32 %v621_v19  ;;  %v626_v24 = vpop.f32.mrb[11].mxu0  ;;  %v709_v25 = vpop.f32.mrb[11].mxu1  ;;  %v625_v28 = vadd.f32 %v624_v22, %v521_v21  ;;  %v708_v30 = vadd.f32 %v707_v23, %v521_v21 }
 0x1e0   : > { %2373 = vtanh.f32 %v704_v20  ;;  %v627_v26 = vadd.f32 %v626_v24, %v521_v21  ;;  %v710_v27 = vadd.f32 %v709_v25, %v521_v21  ;;  %v737_v16 = vpop.permute.xlu0 %736 }
 0x1e2   : > { %2375 = vtanh.f32 %v627_v26 }
 0x1e3   : > { %v2360_v29 = vpop.eup %2359  ;;  %2377 = vtanh.f32 %v710_v27 }
 0x1e4   : > { %v2362_v31 = vpop.eup %2361  ;;  %2379 = vtanh.f32 %v625_v28 }
 0x1e5   : > { %v2364_v32 = vpop.eup %2363  ;;  %2381 = vtanh.f32 %v708_v30 }
 0x1e6   : > { %v2366_v33 = vpop.eup %2365 }
 0x1e7   : > { %v2368_v34 = vpop.eup %2367 }
 0x1e8   : > { %v2370_v35 = vpop.eup %2369  ;;  %v2267_v36 = vpack.c.bf16 %v2368_v34, %v2360_v29 }
 0x1e9   : > { %v2372_v37 = vpop.eup %2371  ;;  %v2271_v38 = vpack.c.bf16 %v2370_v35, %v2362_v31 }
 0x1ea   : > { %v2374_v39 = vpop.eup %2373  ;;  %v2265_v42 = vpack.c.bf16 %v2372_v37, %v2364_v32 }
 0x1eb   : > { %v2269_v43 = vpack.c.bf16 %v2374_v39, %v2366_v33 }
 0x1ec   : > { %2266 = vmatprep.subr.bf16.mxu0 %v2265_v42  ;;  %v2376_v48 = vpop.eup %2375 }
 0x1ed   : > { %2270 = vmatprep.subr.bf16.mxu1 %v2269_v43  ;;  %2268 = vmatpush1.bf16.msra.mxu0 %v2267_v36  ;;  %v2378_v51 = vpop.eup %2377 }
 0x1ee   : > { %2272 = vmatpush1.bf16.msra.mxu1 %v2271_v38  ;;  %2171 = vmatprep.subr.msk.mxu0 %vm533_vm2, %v2376_v48  ;;  %v2380_v53 = vpop.eup %2379 }
 0x1ef   : > { %2176 = vmatprep.subr.msk.mxu1 %vm533_vm2, %v2378_v51  ;;  %v2382_v54 = vpop.eup %2381 }
 0x1f1   : > { %2172 = vmatpush1.msk.msra.mxu0 %vm533_vm2, %v2380_v53 }
 0x1f2   : > { %2177 = vmatpush1.msk.msra.mxu1 %vm533_vm2, %v2382_v54  ;;  %2173 = vmatmul.mubr.msk.f32.vlgmr.msra.gmra.mrb[12].mxu0 %vm523_vm3, %v2155_v52 }
 0x1f3   : > { %2178 = vmatmul.mubr.msk.f32.vlgmr.msra.gmra.mrb[12].mxu1 %vm523_vm3, %v2155_v52  ;;  %830 = vmatprep.mubr.f32.mxu0 %v2567_v1 }
 0x1f4   : > { %913 = vmatprep.mubr.f32.mxu1 %v2567_v1 }
 0x1f6   : > { %2174 = vmatmul.mubr.msk.f32.gmra.mrb[14].mxu0 %vm523_vm3, %v2156_v55 }
 0x1f7   : > { %2179 = vmatmul.mubr.msk.f32.gmra.mrb[14].mxu1 %vm523_vm3, %v2156_v55  ;;  %836 = vmatprep.mubr.f32.mxu0 %v2567_v1 }
 0x1f8   : > { %919 = vmatprep.mubr.f32.mxu1 %v2567_v1 }
 0x1fa   : > { %2175 = vmatmul.mubr.msk.f32.gmra.mrb[16].mxu0 %vm523_vm3, %v2157_v56 }
 0x1fb   : > { %2180 = vmatmul.mubr.msk.f32.gmra.mrb[16].mxu1 %vm523_vm3, %v2157_v56  ;;  %1066 = vmatprep.mubr.f32.mxu0 %v2567_v1 }
 0x1fc   : > { %1149 = vmatprep.mubr.f32.mxu1 %v2567_v1 }
 0x2c5   : > { %v826_v58 = vpop.f32.mrb[12].mxu0 }
 0x2c6   : > { %v827_v63 = vadd.f32 %v826_v58, %v727_v57  ;;  %v909_v0 = vpop.f32.mrb[12].mxu1  ;;  %v828_v2 = vpop.f32.mrb[13].mxu0 }
 0x2c7   : > { %v910_v3 = vadd.f32 %v909_v0, %v727_v57  ;;  %v829_v4 = vadd.f32 %v828_v2, %v727_v57  ;;  %v911_v5 = vpop.f32.mrb[13].mxu1  ;;  %v974_v2 = vpop.permute.xlu0 %973 }
 0x2c8   : > { %2383 = vtanh.f32 %v827_v63  ;;  %v912_v6 = vadd.f32 %v911_v5, %v727_v57 }
 0x2c9   : > { %2385 = vtanh.f32 %v910_v3  ;;  %v832_v8 = vpop.f32.mrb[14].mxu0 }
 0x2ca   : > { %2387 = vtanh.f32 %v829_v4  ;;  %v833_v9 = vadd.f32 %v832_v8, %v732_v7  ;;  %v915_v10 = vpop.f32.mrb[14].mxu1  ;;  %v834_v11 = vpop.f32.mrb[15].mxu0 }
 0x2cb   : > { %2389 = vtanh.f32 %v912_v6  ;;  %v916_v12 = vadd.f32 %v915_v10, %v732_v7  ;;  %v835_v13 = vadd.f32 %v834_v11, %v732_v7  ;;  %v917_v14 = vpop.f32.mrb[15].mxu1 }
 0x2cc   : > { %2391 = vtanh.f32 %v833_v9  ;;  %v918_v15 = vadd.f32 %v917_v14, %v732_v7 }
 0x2cd   : > { %2393 = vtanh.f32 %v916_v12  ;;  %v838_v17 = vpop.f32.mrb[16].mxu0 }
 0x2ce   : > { %2395 = vtanh.f32 %v835_v13  ;;  %v839_v18 = vadd.f32 %v838_v17, %v737_v16  ;;  %v921_v19 = vpop.f32.mrb[16].mxu1  ;;  %v840_v20 = vpop.f32.mrb[17].mxu0 }
 0x2cf   : > { %2397 = vtanh.f32 %v918_v15  ;;  %v841_v21 = vadd.f32 %v840_v20, %v737_v16  ;;  %v923_v22 = vpop.f32.mrb[17].mxu1  ;;  %v922_v23 = vadd.f32 %v921_v19, %v737_v16 }
 0x2d0   : > { %v924_v24 = vadd.f32 %v923_v22, %v737_v16  ;;  %2399 = vtanh.f32 %v839_v18 }
 0x2d1   : > { %2401 = vtanh.f32 %v841_v21 }
 0x2d2   : > { %v2384_v25 = vpop.eup %2383  ;;  %2403 = vtanh.f32 %v924_v24 }
 0x2d3   : > { %v2386_v26 = vpop.eup %2385  ;;  %2405 = vtanh.f32 %v922_v23  ;;  %v2857_v39 = vadd.f32 %v2384_v25, %v2764_v49 }
 0x2d4   : > { %v2388_v27 = vpop.eup %2387  ;;  %v2862_v42 = vadd.f32 %v2386_v26, %v2766_v50 }
 0x2d5   : > { %v2390_v28 = vpop.eup %2389  ;;  %v2842_v34 = vadd.f32 %v2388_v27, %v2756_v44 }
 0x2d6   : > { %v2392_v29 = vpop.eup %2391  ;;  %v2851_v37 = vadd.f32 %v2390_v28, %v2758_v45 }
 0x2d7   : > { %v2394_v30 = vpop.eup %2393  ;;  %v2839_v32 = vadd.f32 %v2392_v29, %v2752_v40 }
 0x2d8   : > { %v2396_v31 = vpop.eup %2395  ;;  %v2848_v36 = vadd.f32 %v2394_v30, %v2754_v41 }
 0x2d9   : > { %v2398_v33 = vpop.eup %2397  ;;  %v2845_v35 = vadd.f32 %v2396_v31, %v2760_v46  ;;  %v2275_v45 = vpack.c.bf16 %v2839_v32, %v2857_v39 }
 0x2da   : > { %v2854_v38 = vadd.f32 %v2398_v33, %v2762_v47  ;;  %v2400_v40 = vpop.eup %2399  ;;  %v2279_v47 = vpack.c.bf16 %v2848_v36, %v2862_v42 }
 0x2db   : > { %v2273_v44 = vpack.c.bf16 %v2845_v35, %v2842_v34  ;;  %v2402_v46 = vpop.eup %2401  ;;  %v2881_v51 = vadd.f32 %v2400_v40, %v2784_v61  ;;  %v2183_v61 = vld [vmem:[%s3105_s3 + $0x40] sm:$0xf] }
 0x2dc   : > { %v2277_v41 = vpack.c.bf16 %v2854_v38, %v2851_v37  ;;  %v2404_v43 = vpop.eup %2403  ;;  %v2871_v49 = vadd.f32 %v2402_v46, %v2776_v59  ;;  %v2181_v59 = vld [vmem:[%s3105_s3 + $0x30] sm:$0xff] }
 0x2dd   : > { %2274 = vmatprep.subr.bf16.mxu0 %v2273_v44  ;;  %v2406_v48 = vpop.eup %2405  ;;  %v2874_v50 = vadd.f32 %v2404_v43, %v2778_v60  ;;  %v2182_v60 = vld [vmem:[%s3105_s3 + $0x38] sm:$0xff]  ;;  %v2187_v44 = vld [vmem:[%s3105_s3 + $0x48] sm:$0xff] }
 0x2de   : > { %2278 = vmatprep.subr.bf16.mxu1 %v2277_v41  ;;  %2276 = vmatpush1.bf16.msra.mxu0 %v2275_v45  ;;  %v2887_v52 = vadd.f32 %v2406_v48, %v2786_v62  ;;  %v969_v62 = vpop.permute.xlu1 %968  ;;  %v2188_v45 = vld [vmem:[%s3105_s3 + $0x50] sm:$0xff]  ;;  %v2189_v43 = vld [vmem:[%s3105_s3 + $0x58] sm:$0xf] }
 0x2df   : > { %2280 = vmatpush1.bf16.msra.mxu1 %v2279_v47  ;;  %2193 = vmatprep.subr.msk.mxu0 %vm533_vm2, %v2871_v49  ;;  %v1183_v47 = vpop.permute.xlu0 %1182 }
 0x2e0   : > { %2198 = vmatprep.subr.msk.mxu1 %vm533_vm2, %v2874_v50 }
 0x2e2   : > { %2194 = vmatpush1.msk.msra.mxu0 %vm533_vm2, %v2881_v51  ;;  %v979_v11 = vpop.permute.xlu1 %978 }
 0x2e3   : > { %2199 = vmatpush1.msk.msra.mxu1 %vm533_vm2, %v2887_v52  ;;  %2195 = vmatmul.mubr.msk.f32.vlgmr.msra.gmra.mrb[18].mxu0 %vm523_vm3, %v2181_v59 }
 0x2e4   : > { %2200 = vmatmul.mubr.msk.f32.vlgmr.msra.gmra.mrb[18].mxu1 %vm523_vm3, %v2181_v59  ;;  %1072 = vmatprep.mubr.f32.mxu0 %v2567_v1 }
 0x2e5   : > { %1155 = vmatprep.mubr.f32.mxu1 %v2567_v1 }
 0x2e7   : > { %2196 = vmatmul.mubr.msk.f32.gmra.mrb[20].mxu0 %vm523_vm3, %v2182_v60 }
 0x2e8   : > { %2201 = vmatmul.mubr.msk.f32.gmra.mrb[20].mxu1 %vm523_vm3, %v2182_v60  ;;  %1078 = vmatprep.mubr.f32.mxu0 %v2567_v1 }
 0x2e9   : > { %1161 = vmatprep.mubr.f32.mxu1 %v2567_v1 }
 0x2eb   : > { %2197 = vmatmul.mubr.msk.f32.gmra.mrb[22].mxu0 %vm523_vm3, %v2183_v61 }
 0x2ec   : > { %2202 = vmatmul.mubr.msk.f32.gmra.mrb[22].mxu1 %vm523_vm3, %v2183_v61  ;;  %1280 = vmatprep.mubr.f32.mxu0 %v2567_v1 }
 0x2ed   : > { %1363 = vmatprep.mubr.f32.mxu1 %v2567_v1 }
 0x3b6   : > { %v1068_v53 = vpop.f32.mrb[18].mxu0 }
 0x3b7   : > { %v1069_v54 = vadd.f32 %v1068_v53, %v969_v62  ;;  %v1151_v55 = vpop.f32.mrb[18].mxu1  ;;  %v1070_v56 = vpop.f32.mrb[19].mxu0 }
 0x3b8   : > { %v1152_v57 = vadd.f32 %v1151_v55, %v969_v62  ;;  %v1071_v58 = vadd.f32 %v1070_v56, %v969_v62  ;;  %v1153_v63 = vpop.f32.mrb[19].mxu1  ;;  %v1188_v56 = vpop.permute.xlu1 %1187 }
 0x3b9   : > { %2407 = vtanh.f32 %v1069_v54  ;;  %v1154_v0 = vadd.f32 %v1153_v63, %v969_v62 }
 0x3ba   : > { %2409 = vtanh.f32 %v1152_v57  ;;  %v1074_v3 = vpop.f32.mrb[20].mxu0 }
 0x3bb   : > { %2411 = vtanh.f32 %v1071_v58  ;;  %v1075_v4 = vadd.f32 %v1074_v3, %v974_v2  ;;  %v1157_v5 = vpop.f32.mrb[20].mxu1  ;;  %v1076_v6 = vpop.f32.mrb[21].mxu0 }
 0x3bc   : > { %2413 = vtanh.f32 %v1154_v0  ;;  %v1158_v7 = vadd.f32 %v1157_v5, %v974_v2  ;;  %v1077_v8 = vadd.f32 %v1076_v6, %v974_v2  ;;  %v1159_v9 = vpop.f32.mrb[21].mxu1  ;;  %v1193_v6 = vpop.permute.xlu0 %1192 }
 0x3bd   : > { %2415 = vtanh.f32 %v1075_v4  ;;  %v1160_v10 = vadd.f32 %v1159_v9, %v974_v2 }
 0x3be   : > { %2417 = vtanh.f32 %v1158_v7  ;;  %v1080_v12 = vpop.f32.mrb[22].mxu0 }
 0x3bf   : > { %2419 = vtanh.f32 %v1077_v8  ;;  %v1163_v13 = vpop.f32.mrb[22].mxu1  ;;  %v1082_v14 = vpop.f32.mrb[23].mxu0  ;;  %v1081_v18 = vadd.f32 %v1080_v12, %v979_v11 }
 0x3c0   : > { %2421 = vtanh.f32 %v1160_v10  ;;  %v1083_v15 = vadd.f32 %v1082_v14, %v979_v11  ;;  %v1165_v16 = vpop.f32.mrb[23].mxu1  ;;  %v1164_v20 = vadd.f32 %v1163_v13, %v979_v11 }
 0x3c1   : > { %v1166_v17 = vadd.f32 %v1165_v16, %v979_v11 }
 0x3c2   : > { %2423 = vtanh.f32 %v1083_v15 }
 0x3c3   : > { %v2408_v19 = vpop.eup %2407  ;;  %2425 = vtanh.f32 %v1166_v17 }
 0x3c4   : > { %v2410_v21 = vpop.eup %2409  ;;  %2427 = vtanh.f32 %v1081_v18 }
 0x3c5   : > { %v2412_v22 = vpop.eup %2411  ;;  %2429 = vtanh.f32 %v1164_v20 }
 0x3c6   : > { %v2414_v23 = vpop.eup %2413 }
 0x3c7   : > { %v2416_v24 = vpop.eup %2415 }
 0x3c8   : > { %v2418_v25 = vpop.eup %2417  ;;  %v2283_v26 = vpack.c.bf16 %v2416_v24, %v2408_v19 }
 0x3c9   : > { %v2420_v27 = vpop.eup %2419  ;;  %v2287_v28 = vpack.c.bf16 %v2418_v25, %v2410_v21 }
 0x3ca   : > { %v2422_v29 = vpop.eup %2421  ;;  %v2281_v30 = vpack.c.bf16 %v2420_v27, %v2412_v22 }
 0x3cb   : > { %v2285_v31 = vpack.c.bf16 %v2422_v29, %v2414_v23 }
 0x3cc   : > { %2282 = vmatprep.subr.bf16.mxu0 %v2281_v30  ;;  %v2424_v33 = vpop.eup %2423 }
 0x3cd   : > { %2286 = vmatprep.subr.bf16.mxu1 %v2285_v31  ;;  %2284 = vmatpush1.bf16.msra.mxu0 %v2283_v26  ;;  %v2426_v40 = vpop.eup %2425 }
 0x3ce   : > { %2288 = vmatpush1.bf16.msra.mxu1 %v2287_v28  ;;  %2203 = vmatprep.subr.msk.mxu0 %vm533_vm2, %v2424_v33  ;;  %v2428_v46 = vpop.eup %2427 }
 0x3cf   : > { %2208 = vmatprep.subr.msk.mxu1 %vm533_vm2, %v2426_v40  ;;  %v2430_v41 = vpop.eup %2429 }
 0x3d1   : > { %2204 = vmatpush1.msk.msra.mxu0 %vm533_vm2, %v2428_v46 }
 0x3d2   : > { %2209 = vmatpush1.msk.msra.mxu1 %vm533_vm2, %v2430_v41  ;;  %2205 = vmatmul.mubr.msk.f32.vlgmr.msra.gmra.mrb[24].mxu0 %vm523_vm3, %v2187_v44 }
 0x3d3   : > { %2210 = vmatmul.mubr.msk.f32.vlgmr.msra.gmra.mrb[24].mxu1 %vm523_vm3, %v2187_v44  ;;  %1286 = vmatprep.mubr.f32.mxu0 %v2567_v1 }
 0x3d4   : > { %1369 = vmatprep.mubr.f32.mxu1 %v2567_v1 }
 0x3d6   : > { %2206 = vmatmul.mubr.msk.f32.gmra.mrb[26].mxu0 %vm523_vm3, %v2188_v45 }
 0x3d7   : > { %2211 = vmatmul.mubr.msk.f32.gmra.mrb[26].mxu1 %vm523_vm3, %v2188_v45  ;;  %1292 = vmatprep.mubr.f32.mxu0 %v2567_v1 }
 0x3d8   : > { %1375 = vmatprep.mubr.f32.mxu1 %v2567_v1 }
 0x3da   : > { %2207 = vmatmul.mubr.msk.f32.gmra.mrb[28].mxu0 %vm523_vm3, %v2189_v43 }
 0x3db   : > { %2212 = vmatmul.mubr.msk.f32.gmra.mrb[28].mxu1 %vm523_vm3, %v2189_v43  ;;  %1522 = vmatprep.mubr.f32.mxu0 %v2567_v1 }
 0x3dc   : > { %1605 = vmatprep.mubr.f32.mxu1 %v2567_v1 }
 0x4a5   : > { %v1282_v48 = vpop.f32.mrb[24].mxu0 }
 0x4a6   : > { %v1283_v59 = vadd.f32 %v1282_v48, %v1183_v47  ;;  %v1365_v60 = vpop.f32.mrb[24].mxu1  ;;  %v1284_v61 = vpop.f32.mrb[25].mxu0 }
 0x4a7   : > { %v1366_v62 = vadd.f32 %v1365_v60, %v1183_v47  ;;  %v1285_v53 = vadd.f32 %v1284_v61, %v1183_v47  ;;  %v1367_v54 = vpop.f32.mrb[25].mxu1  ;;  %v1430_v61 = vpop.permute.xlu0 %1429 }
 0x4a8   : > { %2431 = vtanh.f32 %v1283_v59  ;;  %v1368_v55 = vadd.f32 %v1367_v54, %v1183_v47 }
 0x4a9   : > { %2433 = vtanh.f32 %v1366_v62  ;;  %v1288_v57 = vpop.f32.mrb[26].mxu0 }
 0x4aa   : > { %2435 = vtanh.f32 %v1285_v53  ;;  %v1289_v58 = vadd.f32 %v1288_v57, %v1188_v56  ;;  %v1371_v63 = vpop.f32.mrb[26].mxu1  ;;  %v1290_v0 = vpop.f32.mrb[27].mxu0 }
 0x4ab   : > { %2437 = vtanh.f32 %v1368_v55  ;;  %v1372_v2 = vadd.f32 %v1371_v63, %v1188_v56  ;;  %v1291_v3 = vadd.f32 %v1290_v0, %v1188_v56  ;;  %v1373_v4 = vpop.f32.mrb[27].mxu1 }
 0x4ac   : > { %2439 = vtanh.f32 %v1289_v58  ;;  %v1374_v5 = vadd.f32 %v1373_v4, %v1188_v56 }
 0x4ad   : > { %2441 = vtanh.f32 %v1372_v2  ;;  %v1294_v7 = vpop.f32.mrb[28].mxu0 }
 0x4ae   : > { %2443 = vtanh.f32 %v1291_v3  ;;  %v1295_v8 = vadd.f32 %v1294_v7, %v1193_v6  ;;  %v1377_v9 = vpop.f32.mrb[28].mxu1  ;;  %v1296_v10 = vpop.f32.mrb[29].mxu0 }
 0x4af   : > { %2445 = vtanh.f32 %v1374_v5  ;;  %v1297_v11 = vadd.f32 %v1296_v10, %v1193_v6  ;;  %v1379_v12 = vpop.f32.mrb[29].mxu1  ;;  %v1378_v13 = vadd.f32 %v1377_v9, %v1193_v6 }
 0x4b0   : > { %v1380_v14 = vadd.f32 %v1379_v12, %v1193_v6  ;;  %2447 = vtanh.f32 %v1295_v8 }
 0x4b1   : > { %2449 = vtanh.f32 %v1297_v11 }
 0x4b2   : > { %v2432_v15 = vpop.eup %2431  ;;  %2451 = vtanh.f32 %v1380_v14 }
 0x4b3   : > { %v2434_v16 = vpop.eup %2433  ;;  %2453 = vtanh.f32 %v1378_v13  ;;  %v2955_v29 = vadd.f32 %v2432_v15, %v2857_v39 }
 0x4b4   : > { %v2436_v17 = vpop.eup %2435  ;;  %v2960_v30 = vadd.f32 %v2434_v16, %v2862_v42 }
 0x4b5   : > { %v2438_v18 = vpop.eup %2437  ;;  %v2940_v24 = vadd.f32 %v2436_v17, %v2842_v34 }
 0x4b6   : > { %v2440_v19 = vpop.eup %2439  ;;  %v2949_v27 = vadd.f32 %v2438_v18, %v2851_v37 }
 0x4b7   : > { %v2442_v20 = vpop.eup %2441  ;;  %v2937_v22 = vadd.f32 %v2440_v19, %v2839_v32 }
 0x4b8   : > { %v2444_v21 = vpop.eup %2443  ;;  %v2946_v26 = vadd.f32 %v2442_v20, %v2848_v36 }
 0x4b9   : > { %v2446_v23 = vpop.eup %2445  ;;  %v2943_v25 = vadd.f32 %v2444_v21, %v2845_v35  ;;  %v2291_v37 = vpack.c.bf16 %v2937_v22, %v2955_v29 }
 0x4ba   : > { %v2952_v28 = vadd.f32 %v2446_v23, %v2854_v38  ;;  %v2448_v32 = vpop.eup %2447  ;;  %v2295_v38 = vpack.c.bf16 %v2946_v26, %v2960_v30 }
 0x4bb   : > { %v2289_v34 = vpack.c.bf16 %v2943_v25, %v2940_v24  ;;  %v2450_v35 = vpop.eup %2449  ;;  %v2979_v40 = vadd.f32 %v2448_v32, %v2881_v51  ;;  %v2215_v51 = vld [vmem:[%s3105_s3 + $0x70] sm:$0xf] }
 0x4bc   : > { %v2293_v36 = vpack.c.bf16 %v2952_v28, %v2949_v27  ;;  %v2452_v31 = vpop.eup %2451  ;;  %v2969_v39 = vadd.f32 %v2450_v35, %v2871_v49  ;;  %v2213_v49 = vld [vmem:[%s3105_s3 + $0x60] sm:$0xff] }
 0x4bd   : > { %2290 = vmatprep.subr.bf16.mxu0 %v2289_v34  ;;  %v2454_v33 = vpop.eup %2453  ;;  %v2972_v42 = vadd.f32 %v2452_v31, %v2874_v50  ;;  %v2214_v50 = vld [vmem:[%s3105_s3 + $0x68] sm:$0xff]  ;;  %v2219_v34 = vld [vmem:[%s3105_s3 + $0x78] sm:$0xff] }
 0x4be   : > { %2294 = vmatprep.subr.bf16.mxu1 %v2293_v36  ;;  %2292 = vmatpush1.bf16.msra.mxu0 %v2291_v37  ;;  %v2985_v44 = vadd.f32 %v2454_v33, %v2887_v52  ;;  %v1425_v52 = vpop.permute.xlu1 %1424  ;;  %v2220_v37 = vld [vmem:[%s3105_s3 + $0x80] sm:$0xff]  ;;  %v2221_v31 = vld [vmem:[%s3105_s3 + $0x88] sm:$0xf] }
 0x4bf   : > { %2296 = vmatpush1.bf16.msra.mxu1 %v2295_v38  ;;  %2225 = vmatprep.subr.msk.mxu0 %vm533_vm2, %v2969_v39  ;;  %v1639_v38 = vpop.permute.xlu0 %1638 }
 0x4c0   : > { %2230 = vmatprep.subr.msk.mxu1 %vm533_vm2, %v2972_v42 }
 0x4c2   : > { %2226 = vmatpush1.msk.msra.mxu0 %vm533_vm2, %v2979_v40  ;;  %v1435_v0 = vpop.permute.xlu1 %1434 }
 0x4c3   : > { %2231 = vmatpush1.msk.msra.mxu1 %vm533_vm2, %v2985_v44  ;;  %2227 = vmatmul.mubr.msk.f32.vlgmr.msra.gmra.mrb[30].mxu0 %vm523_vm3, %v2213_v49 }
 0x4c4   : > { %2232 = vmatmul.mubr.msk.f32.vlgmr.msra.gmra.mrb[30].mxu1 %vm523_vm3, %v2213_v49  ;;  %1528 = vmatprep.mubr.f32.mxu0 %v2567_v1 }
 0x4c5   : > { %1611 = vmatprep.mubr.f32.mxu1 %v2567_v1 }
 0x4c7   : > { %2228 = vmatmul.mubr.msk.f32.gmra.mrb[32].mxu0 %vm523_vm3, %v2214_v50 }
 0x4c8   : > { %2233 = vmatmul.mubr.msk.f32.gmra.mrb[32].mxu1 %vm523_vm3, %v2214_v50  ;;  %1534 = vmatprep.mubr.f32.mxu0 %v2567_v1 }
 0x4c9   : > { %1617 = vmatprep.mubr.f32.mxu1 %v2567_v1 }
 0x4cb   : > { %2229 = vmatmul.mubr.msk.f32.gmra.mrb[34].mxu0 %vm523_vm3, %v2215_v51 }
 0x4cc   : > { %2234 = vmatmul.mubr.msk.f32.gmra.mrb[34].mxu1 %vm523_vm3, %v2215_v51  ;;  %1736 = vmatprep.mubr.f32.mxu0 %v2567_v1 }
 0x4cd   : > { %1819 = vmatprep.mubr.f32.mxu1 %v2567_v1 }
 0x596   : > { %v1524_v46 = vpop.f32.mrb[30].mxu0 }
 0x597   : > { %v1525_v41 = vadd.f32 %v1524_v46, %v1425_v52  ;;  %v1607_v45 = vpop.f32.mrb[30].mxu1  ;;  %v1526_v43 = vpop.f32.mrb[31].mxu0 }
 0x598   : > { %v1608_v47 = vadd.f32 %v1607_v45, %v1425_v52  ;;  %v1527_v48 = vadd.f32 %v1526_v43, %v1425_v52  ;;  %v1609_v59 = vpop.f32.mrb[31].mxu1  ;;  %v1644_v43 = vpop.permute.xlu1 %1643 }
 0x599   : > { %2455 = vtanh.f32 %v1525_v41  ;;  %v1610_v60 = vadd.f32 %v1609_v59, %v1425_v52 }
 0x59a   : > { %2457 = vtanh.f32 %v1608_v47  ;;  %v1530_v62 = vpop.f32.mrb[32].mxu0 }
 0x59b   : > { %2459 = vtanh.f32 %v1527_v48  ;;  %v1531_v53 = vadd.f32 %v1530_v62, %v1430_v61  ;;  %v1613_v54 = vpop.f32.mrb[32].mxu1  ;;  %v1532_v55 = vpop.f32.mrb[33].mxu0 }
 0x59c   : > { %2461 = vtanh.f32 %v1610_v60  ;;  %v1614_v56 = vadd.f32 %v1613_v54, %v1430_v61  ;;  %v1533_v57 = vadd.f32 %v1532_v55, %v1430_v61  ;;  %v1615_v58 = vpop.f32.mrb[33].mxu1  ;;  %v1649_v54 = vpop.permute.xlu0 %1648 }
 0x59d   : > { %2463 = vtanh.f32 %v1531_v53  ;;  %v1616_v63 = vadd.f32 %v1615_v58, %v1430_v61 }
 0x59e   : > { %2465 = vtanh.f32 %v1614_v56  ;;  %v1536_v2 = vpop.f32.mrb[34].mxu0 }
 0x59f   : > { %2467 = vtanh.f32 %v1533_v57  ;;  %v1619_v3 = vpop.f32.mrb[34].mxu1  ;;  %v1538_v4 = vpop.f32.mrb[35].mxu0  ;;  %v1537_v8 = vadd.f32 %v1536_v2, %v1435_v0 }
 0x5a0   : > { %2469 = vtanh.f32 %v1616_v63  ;;  %v1539_v5 = vadd.f32 %v1538_v4, %v1435_v0  ;;  %v1621_v6 = vpop.f32.mrb[35].mxu1  ;;  %v1620_v10 = vadd.f32 %v1619_v3, %v1435_v0 }
 0x5a1   : > { %v1622_v7 = vadd.f32 %v1621_v6, %v1435_v0 }
 0x5a2   : > { %2471 = vtanh.f32 %v1539_v5 }
 0x5a3   : > { %v2456_v9 = vpop.eup %2455  ;;  %2473 = vtanh.f32 %v1622_v7 }
 0x5a4   : > { %v2458_v11 = vpop.eup %2457  ;;  %2475 = vtanh.f32 %v1537_v8 }
 0x5a5   : > { %v2460_v12 = vpop.eup %2459  ;;  %2477 = vtanh.f32 %v1620_v10 }
 0x5a6   : > { %v2462_v13 = vpop.eup %2461 }
 0x5a7   : > { %v2464_v14 = vpop.eup %2463 }
 0x5a8   : > { %v2466_v15 = vpop.eup %2465  ;;  %v2299_v16 = vpack.c.bf16 %v2464_v14, %v2456_v9 }
 0x5a9   : > { %v2468_v17 = vpop.eup %2467  ;;  %v2303_v18 = vpack.c.bf16 %v2466_v15, %v2458_v11 }
 0x5aa   : > { %v2470_v19 = vpop.eup %2469  ;;  %v2297_v20 = vpack.c.bf16 %v2468_v17, %v2460_v12 }
 0x5ab   : > { %v2301_v21 = vpack.c.bf16 %v2470_v19, %v2462_v13 }
 0x5ac   : > { %2298 = vmatprep.subr.bf16.mxu0 %v2297_v20  ;;  %v2472_v23 = vpop.eup %2471 }
 0x5ad   : > { %2302 = vmatprep.subr.bf16.mxu1 %v2301_v21  ;;  %2300 = vmatpush1.bf16.msra.mxu0 %v2299_v16  ;;  %v2474_v32 = vpop.eup %2473 }
 0x5ae   : > { %2304 = vmatpush1.bf16.msra.mxu1 %v2303_v18  ;;  %2235 = vmatprep.subr.msk.mxu0 %vm533_vm2, %v2472_v23  ;;  %v2476_v35 = vpop.eup %2475 }
 0x5af   : > { %2240 = vmatprep.subr.msk.mxu1 %vm533_vm2, %v2474_v32  ;;  %v2478_v36 = vpop.eup %2477 }
 0x5b1   : > { %2236 = vmatpush1.msk.msra.mxu0 %vm533_vm2, %v2476_v35  ;;  %v2569_v35 = vmov 1966171168  }
 0x5b2   : > { %2241 = vmatpush1.msk.msra.mxu1 %vm533_vm2, %v2478_v36  ;;  %2237 = vmatmul.mubr.msk.f32.vlgmr.msra.gmra.mrb[36].mxu0 %vm523_vm3, %v2219_v34  ;;  %v2037_v36 = vunpack.c.l.s4 %v2569_v35 }
 0x5b3   : > { %2242 = vmatmul.mubr.msk.f32.vlgmr.msra.gmra.mrb[36].mxu1 %vm523_vm3, %v2219_v34  ;;  %1742 = vmatprep.mubr.f32.mxu0 %v2567_v1 }
 0x5b4   : > { %1825 = vmatprep.mubr.f32.mxu1 %v2567_v1 }
 0x5b6   : > { %2238 = vmatmul.mubr.msk.f32.gmra.mrb[38].mxu0 %vm523_vm3, %v2220_v37 }
 0x5b7   : > { %2243 = vmatmul.mubr.msk.f32.gmra.mrb[38].mxu1 %vm523_vm3, %v2220_v37  ;;  %1748 = vmatprep.mubr.f32.mxu0 %v2567_v1 }
 0x5b8   : > { %1831 = vmatprep.mubr.f32.mxu1 %v2567_v1 }
 0x5ba   : > { %2239 = vmatmul.mubr.msk.f32.gmra.mrb[40].mxu0 %vm523_vm3, %v2221_v31 }
 0x5bb   : > { %2244 = vmatmul.mubr.msk.f32.gmra.mrb[40].mxu1 %vm523_vm3, %v2221_v31  ;;  %1952 = vmatprep.mubr.f32.mxu0 %v2567_v1  ;;  %v2038_v31 = vunpack.c.0.s8 %v2037_v36 }
 0x5bc   : > { %2023 = vmatprep.mubr.f32.mxu1 %v2567_v1 }
 0x685   : > { %v1738_v33 = vpop.f32.mrb[36].mxu0 }
 0x686   : > { %v1739_v49 = vadd.f32 %v1738_v33, %v1639_v38  ;;  %v1821_v50 = vpop.f32.mrb[36].mxu1  ;;  %v1740_v51 = vpop.f32.mrb[37].mxu0 }
 0x687   : > { %v1822_v52 = vadd.f32 %v1821_v50, %v1639_v38  ;;  %v1741_v46 = vadd.f32 %v1740_v51, %v1639_v38  ;;  %v1823_v41 = vpop.f32.mrb[37].mxu1 }
 0x688   : > { %2479 = vtanh.f32 %v1739_v49  ;;  %v1824_v45 = vadd.f32 %v1823_v41, %v1639_v38 }
 0x689   : > { %2481 = vtanh.f32 %v1822_v52  ;;  %v1744_v47 = vpop.f32.mrb[38].mxu0 }
 0x68a   : > { %2483 = vtanh.f32 %v1741_v46  ;;  %v1745_v48 = vadd.f32 %v1744_v47, %v1644_v43  ;;  %v1827_v59 = vpop.f32.mrb[38].mxu1  ;;  %v1746_v60 = vpop.f32.mrb[39].mxu0 }
 0x68b   : > { %2485 = vtanh.f32 %v1824_v45  ;;  %v1828_v61 = vadd.f32 %v1827_v59, %v1644_v43  ;;  %v1747_v1 = vadd.f32 %v1746_v60, %v1644_v43  ;;  %v1829_v62 = vpop.f32.mrb[39].mxu1 }
 0x68c   : > { %2487 = vtanh.f32 %v1745_v48  ;;  %v1830_v53 = vadd.f32 %v1829_v62, %v1644_v43 }
 0x68d   : > { %2489 = vtanh.f32 %v1828_v61  ;;  %v1750_v55 = vpop.f32.mrb[40].mxu0 }
 0x68e   : > { %2491 = vtanh.f32 %v1747_v1  ;;  %v1751_v56 = vadd.f32 %v1750_v55, %v1649_v54  ;;  %v1833_v57 = vpop.f32.mrb[40].mxu1  ;;  %v1752_v58 = vpop.f32.mrb[41].mxu0 }
 0x68f   : > { %2493 = vtanh.f32 %v1830_v53  ;;  %v1753_v63 = vadd.f32 %v1752_v58, %v1649_v54  ;;  %v1835_v0 = vpop.f32.mrb[41].mxu1  ;;  %v1834_v2 = vadd.f32 %v1833_v57, %v1649_v54 }
 0x690   : > { %v1836_v3 = vadd.f32 %v1835_v0, %v1649_v54  ;;  %2495 = vtanh.f32 %v1751_v56 }
 0x691   : > { %2497 = vtanh.f32 %v1753_v63 }
 0x692   : > { %v2480_v4 = vpop.eup %2479  ;;  %2499 = vtanh.f32 %v1836_v3 }
 0x693   : > { %v2482_v5 = vpop.eup %2481  ;;  %2501 = vtanh.f32 %v1834_v2  ;;  %v1850_v10 = vadd.f32 %v2480_v4, %v2955_v29 }
 0x694   : > { %v2484_v6 = vpop.eup %2483  ;;  %v1852_v13 = vadd.f32 %v2482_v5, %v2960_v30 }
 0x695   : > { %v2486_v7 = vpop.eup %2485  ;;  %v1851_v16 = vadd.f32 %v2484_v6, %v2940_v24 }
 0x696   : > { %v2488_v8 = vpop.eup %2487  ;;  %v1853_v19 = vadd.f32 %v2486_v7, %v2949_v27  ;;  %v1862_v27 = vld [vmem:[%s3107_s5] sm:$0x1] }
 0x697   : > { %v2490_v9 = vpop.eup %2489  ;;  %v1854_v11 = vadd.f32 %v2488_v8, %v2937_v22 }
 0x698   : > { %v2492_v12 = vpop.eup %2491  ;;  %v1856_v14 = vadd.f32 %v2490_v9, %v2946_v26 }
 0x699   : > { %v2494_v15 = vpop.eup %2493  ;;  %v1855_v17 = vadd.f32 %v2492_v12, %v2943_v25  ;;  %v2307_v18 = vpack.c.bf16 %v1854_v11, %v1850_v10 }
 0x69a   : > { %v1857_v20 = vadd.f32 %v2494_v15, %v2952_v28  ;;  %v2311_v21 = vpack.c.bf16 %v1856_v14, %v1852_v13  ;;  %v2496_v23 = vpop.eup %2495 }
 0x69b   : > { %v2305_v29 = vpack.c.bf16 %v1855_v17, %v1851_v16  ;;  %v2498_v32 = vpop.eup %2497  ;;  %v1858_v25 = vadd.f32 %v2496_v23, %v2979_v40  ;;  %v1867_v40 = vpop.permute.xlu1 %1866 }
 0x69c   : > { %v2309_v22 = vpack.c.bf16 %v1857_v20, %v1853_v19  ;;  %v2500_v34 = vpop.eup %2499  ;;  %v1859_v30 = vadd.f32 %v2498_v32, %v2969_v39  ;;  %v1869_v39 = vlaneseq }
 0x69d   : > { %2306 = vmatprep.subr.bf16.mxu0 %v2305_v29  ;;  %v2502_v26 = vpop.eup %2501  ;;  %v1861_v24 = vadd.f32 %v2500_v34, %v2972_v42 }
 0x69e   : > { %2310 = vmatprep.subr.bf16.mxu1 %v2309_v22  ;;  %2308 = vmatpush1.bf16.msra.mxu0 %v2307_v18  ;;  %v1860_v28 = vadd.f32 %v2502_v26, %v2985_v44  ;;  %v1870_v42 = vshrl.u32 %v1869_v39, 7  ;;  %vm2061_vm4 = vcmp.lt.s32.totalorder %v1869_v39, 512 }
 0x69f   : > { %2312 = vmatpush1.bf16.msra.mxu1 %v2311_v21  ;;  %2245 = vmatprep.subr.msk.mxu0 %vm533_vm2, %v1859_v30 }
 0x6a0   : > { %2248 = vmatprep.subr.msk.mxu1 %vm533_vm2, %v1861_v24  ;;  %v1871_v37 = vsub.s32 0, %v1870_v42  ;;  %v2041_v51 = vsub.s32 %v2038_v31, %v1870_v42 }
 0x6a2   : > { %2246 = vmatpush1.msk.msra.mxu0 %vm533_vm2, %v1858_v25  ;;  %v1872_v38 = vrot.slane %v1867_v40, %v1871_v37 }
 0x6a3   : > { %2249 = vmatpush1.msk.msra.mxu1 %vm533_vm2, %v1860_v28  ;;  %2247 = vmatmul.mubr.msk.f32.vlgmr.msra.gmra.mrb[42].mxu0 %vm523_vm3, %v1862_v27 }
 0x6a4   : > { %2250 = vmatmul.mubr.msk.f32.vlgmr.msra.gmra.mrb[42].mxu1 %vm523_vm3, %v1862_v27 }
 0x776   : > { %v1954_v33 = vpop.f32.mrb[42].mxu0 }
 0x777   : > { %v1955_v44 = vadd.f32 %v1954_v33, %v1872_v38  ;;  %v2025_v49 = vpop.f32.mrb[42].mxu1  ;;  %v1956_v50 = vpop.f32.mrb[43].mxu0 }
 0x778   : > { %v2026_v52 = vadd.f32 %v2025_v49, %v1872_v38  ;;  %v1957_v46 = vadd.f32 %v1956_v50, %v1872_v38  ;;  %v2027_v41 = vpop.f32.mrb[43].mxu1 }
 0x779   : > { %v2028_v45 = vadd.f32 %v2027_v41, %v1872_v38 }
 0x77a   : > { %v2034_v43 = vcombine.low %v1955_v44, %v1957_v46 }
 0x77b   : > { %v2035_v47 = vcombine.low %v2026_v52, %v2028_v45 }
 0x77c   : > { %v2042_v48 = vrot.slane %v2034_v43, %v2041_v51 }
 0x77d   : > { %v2049_v59 = vrot.slane %v2035_v47, %v2041_v51 }
 0x77f   : > { %v2050_v60 = vcombine.low %v2042_v48, %v2049_v59 }
 0x781   : > { %v2057_v61 = vrot.slane %v2050_v60, %v2041_v51 }
 0x783   : > { %2063 = vst.msk [vmem:[%s274_s18] sm:$0xf] %vm2061_vm4, %v2057_v61 }
 0x784   : > { %2516 = shalt.err (!%p2513_p3)
}
 0x785   : > { %s2517_s9 = scalar_lea.hbm %s3060_s22, 64  ;;  %s2521_s15 = scalar_lea.hbm %s3109_s7, 128 }
 0x786   : > { %p2518_p4 = scmp.ne.s32.totalorder %s3060_s22, %s2517_s9  ;;  %p2522_p9 = scmp.lt.u32.totalorder %s3060_s22, %s3109_s7 }
 0x787   : > { %p2523_p10 = scmp.lt.u32.totalorder %s2521_s15, %s2517_s9  ;;  %p2525_p12 = scmp.lt.u32.totalorder %s2517_s9, %s3060_s22 }
 0x788   : > { %p2519_p7 = pnand %p2518_p4, %p2652_p5 }
 0x789   : > { %p2524_p11 = por %p2523_p10, %p2522_p9 }
 0x78a   : > { %p2520_p8 = pneg %p2519_p7 }
 0x78b   : > { %p2526_p13 = por %p2525_p12, %p2524_p11 }
 0x78d   : > { %p2527_p0 = pnand %p2526_p13, %p2520_p8 }
 0x78f   : > { %2530 = shalt.err (!%p2527_p0)
}
 0x790   : > { %2313 = dma.vmem_to_hbm [thread:$0]  (%p2652_p5), %s3062_s19, 64, %s3060_s22, %s2065_s23  }
 0x791 PF: > { %p2319_p1 = scmp.ge.s32.totalorder %s2565_s29, 2  ;;  %s2091_s18 = sand.u32 1, %s2553_s26  }
 0x792   : > { %s2092_s20 = scalar_lea.sflag [#allocation4], %s2091_s18 }
 0x793   : > { %p2316_p2 = pnand %p2319_p1, %p2656_p6 }
 0x795   : > { %2548 = dma.done.wait (!%p2316_p2), %s2092_s20, 64  }
 0x796   : > { %2550 = vsyncadd (!%p2316_p2), %s2092_s20, 4294967232  ;;  %p19_p3 = scmp.ge.s32.totalorder %s2639_s8, 4   ;;  %s3112_s26 = smov %s2557_s27 }
 0x797   : > { %s3113_s27 = smov %s2561_s28  ;;  %s3114_s28 = smov %s2650_s11 }
 0x798   : > { %s3115_s29 = smov %s2639_s8  ;;  %21 = sbr.rel (!%p19_p3) target bundleno = 6 (0x6), region = 93 }
 0x79f   :  { %2097 = vsyncpa [#allocation4], 1 }
 0x7a0   :  { %2099 = vsyncpa [#allocation4 + $0x1], 1 }

</bundles_post_ra>
